<compile_context>
chip_gen: v6e
topology: v6e:2x2x1
jax: 0.10.0
libtpu: 0.0.40
codegen_flags: <defaults>
</compile_context>

<pallas_src>
import functools
from typing import NamedTuple, Tuple

import numpy as np
import jax
import jax.numpy as jnp
from jax import lax
from jax.experimental import pallas as pl
from jax.experimental.pallas import tpu as pltpu

_BN_EPS = 1e-5


# ----------------------------- static layout metadata ---------------------------

class Layer(NamedTuple):
    row: int      # first row of this layer's weight in the weight slab
    k: int        # input dim
    n: int        # output dim
    boff: int     # bias column offset in the bias slab (-1 if no bias)
    final: bool   # final layer (no bias, no ReLU)


class MapperConfig(NamedTuple):
    layer0: Layer                  # fused dir+mag layer 0 ([mag | dir] outputs)
    n_mag0: int                    # width of the mag part of the fused layer-0 output
    mag_tail: Tuple[Layer, ...]    # mag layers 1..L-1
    dir_tail: Tuple[Layer, ...]    # dir layers 1..L-1


def _round_up(x, m):
    return ((x + m - 1) // m) * m


# ----------------------------- fused Pallas kernel ------------------------------

def _run_tail(h, w_ref, b_ref, layers):
    """[Linear -> ReLU] * (len-1) -> Linear(no bias), all weights from static
    slices of the VMEM-resident slab."""
    for lyr in layers:
        w = w_ref[lyr.row:lyr.row + lyr.k, 0:lyr.n]
        h = jnp.dot(h, w, preferred_element_type=jnp.float32)
        if not lyr.final:
            b = b_ref[0:1, lyr.boff:lyr.boff + lyr.n]
            h = jnp.maximum(h + b, 0.0)
    return h


def _fused_mapper_kernel(cfg: MapperConfig, x_a_ref, emb_ref, w_ref, b_ref, out_ref):
    x_a = x_a_ref[...].astype(jnp.float32)
    emb = emb_ref[...].astype(jnp.float32)
    da = x_a.shape[1]

    # Fused layer 0 of BOTH MLPs: one N=288 output, two K=32 dots (the input
    # concat is eliminated by splitting the combined W0 along its input rows).
    l0 = cfg.layer0
    w0_a = w_ref[l0.row:l0.row + da, 0:l0.n]
    w0_b = w_ref[l0.row + da:l0.row + l0.k, 0:l0.n]
    b0 = b_ref[0:1, l0.boff:l0.boff + l0.n]
    h0 = (jnp.dot(x_a, w0_a, preferred_element_type=jnp.float32)
          + jnp.dot(emb, w0_b, preferred_element_type=jnp.float32)
          + b0)
    h0 = jnp.maximum(h0, 0.0)

    # mag occupies lanes [0, n_mag0), dir occupies [n_mag0, l0.n): both slices
    # start on 128-lane boundaries by construction (mag width 256).
    hm = h0[:, 0:cfg.n_mag0]
    hd = h0[:, cfg.n_mag0:l0.n]

    d = _run_tail(hd, w_ref, b_ref, cfg.dir_tail)   # (tm, shape_latent_dim)
    m = _run_tail(hm, w_ref, b_ref, cfg.mag_tail)   # (tm, 1)

    # F.normalize(dir, dim=1, eps=1e-12):  d / max(||d||_2, 1e-12)  (f32 epilogue)
    sumsq = jnp.sum(d * d, axis=1, keepdims=True)
    inv = lax.rsqrt(jnp.maximum(sumsq, 1e-24))
    out_ref[...] = (d * inv * m).astype(out_ref.dtype)


# ----------------------------- host-side param packing --------------------------

def pack_mapper_params(dir_params, mag_params):
    """Fold eval-mode BatchNorm into every non-final Linear, fuse layer 0 of the
    dir and mag MLPs along the output dim, and pack ALL weights / biases into
    one weight slab + one bias slab (2 DMAs total).  Returns
    (w_slab, b_slab, cfg) where cfg is static layout metadata."""
    assert len(dir_params) >= 2 and len(mag_params) >= 2, "need >= 2 layers per MLP"

    def fold(p, is_final):
        if is_final:
            return np.asarray(p["w"], np.float32), None
        scale = np.asarray(p["gamma"], np.float32) / np.sqrt(
            np.asarray(p["running_var"], np.float32) + _BN_EPS)
        shift = np.asarray(p["beta"], np.float32) - np.asarray(p["running_mean"], np.float32) * scale
        w = np.asarray(p["w"], np.float32) * scale
        b = np.asarray(p["b"], np.float32) * scale + shift
        return w, b

    dir_f = [fold(p, i == len(dir_params) - 1) for i, p in enumerate(dir_params)]
    mag_f = [fold(p, i == len(mag_params) - 1) for i, p in enumerate(mag_params)]

    # Fused layer 0, mag block first so both in-kernel activation slices start
    # on 128-lane boundaries ([0:256] mag, [256:288] dir for the demo config).
    w0 = np.concatenate([mag_f[0][0], dir_f[0][0]], axis=1)
    b0 = np.concatenate([mag_f[0][1], dir_f[0][1]], axis=1)
    n_mag0 = mag_f[0][0].shape[1]

    weights = []    # (row, array)
    bias_segs = []  # (col offset, array)
    row_off = 0
    bias_off = 0

    def add_w(w):
        nonlocal row_off
        r = row_off
        weights.append((r, w))
        row_off += _round_up(w.shape[0], 8)        # keep every block 8-row aligned
        return r

    def add_b(b):
        nonlocal bias_off
        o = bias_off
        bias_segs.append((o, b))
        bias_off += _round_up(b.shape[1], 128)     # keep every segment 128-lane aligned
        return o

    layer0 = Layer(add_w(w0), w0.shape[0], w0.shape[1], add_b(b0), False)

    def build_tail(folded):
        tail = []
        for w, b in folded[1:]:
            final = b is None
            r = add_w(w)
            bo = -1 if final else add_b(b)
            tail.append(Layer(r, w.shape[0], w.shape[1], bo, final))
        return tuple(tail)

    mag_tail = build_tail(mag_f)
    dir_tail = build_tail(dir_f)

    max_cols = _round_up(max(w.shape[1] for _, w in weights), 128)
    w_slab = np.zeros((row_off, max_cols), np.float32)
    for r, w in weights:
        w_slab[r:r + w.shape[0], :w.shape[1]] = w

    b_slab = np.zeros((1, max(bias_off, 128)), np.float32)
    for o, b in bias_segs:
        b_slab[0, o:o + b.shape[1]] = b[0]

    cfg = MapperConfig(layer0=layer0, n_mag0=int(n_mag0),
                       mag_tail=mag_tail, dir_tail=dir_tail)
    return jnp.asarray(w_slab), jnp.asarray(b_slab), cfg


# --------------------------------- forward call ----------------------------------

@functools.partial(jax.jit, static_argnames=("cfg",))
def mlp_latent_mapper_forward(x_a, embed_ab, w_slab, b_slab, cfg: MapperConfig):
    B, da = x_a.shape
    de = embed_ab.shape[1]
    out_dim = cfg.dir_tail[-1].n

    # Batch tile: tm <= 256 keeps the per-step activation footprint tiny even
    # on v7x's 64 MiB VMEM; weights stay resident via constant index_maps.
    tm = B if B <= 256 else 256
    grid = (pl.cdiv(B, tm),)

    kernel = functools.partial(_fused_mapper_kernel, cfg)

    flops = 2 * B * (cfg.layer0.k * cfg.layer0.n
                     + sum(l.k * l.n for l in cfg.mag_tail + cfg.dir_tail))
    bytes_accessed = (w_slab.size * 4 + b_slab.size * 4
                      + (x_a.size + embed_ab.size + B * out_dim) * 4)
    cost = pl.CostEstimate(flops=flops, transcendentals=B,
                           bytes_accessed=bytes_accessed)

    return pl.pallas_call(
        kernel,
        out_shape=jax.ShapeDtypeStruct((B, out_dim), jnp.float32),
        grid=grid,
        in_specs=[
            pl.BlockSpec((tm, da), lambda i: (i, 0)),
            pl.BlockSpec((tm, de), lambda i: (i, 0)),
            pl.BlockSpec(w_slab.shape, lambda i: (0, 0)),   # resident weight slab
            pl.BlockSpec(b_slab.shape, lambda i: (0, 0)),   # resident bias slab
        ],
        out_specs=pl.BlockSpec((tm, out_dim), lambda i: (i, 0)),
        compiler_params=pltpu.CompilerParams(
            dimension_semantics=("parallel",)),
        cost_estimate=cost,
    )(x_a, embed_ab, w_slab, b_slab)


# ----------------------------- pure-JAX reference --------------------------------

def make_mlp_params(key, in_dim, out_channels):
    """Deterministic raw (unfolded) params; BN uses non-trivial running stats so
    the host-side fold is actually exercised."""
    params = []
    prev = in_dim
    n = len(out_channels)
    for depth, out_dim in enumerate(out_channels):
        key, kw, kb, kg, kbt, km, kv = jax.random.split(key, 7)
        w = jax.random.normal(kw, (prev, out_dim), jnp.float32) * 0.1
        if depth == n - 1:
            params.append({"w": w})                          # remove_final_bias
        else:
            b = jax.random.normal(kb, (1, out_dim), jnp.float32) * 0.1
            gamma = 1.0 + 0.1 * jax.random.normal(kg, (1, out_dim), jnp.float32)
            beta = 0.1 * jax.random.normal(kbt, (1, out_dim), jnp.float32)
            running_mean = 0.1 * jax.random.normal(km, (1, out_dim), jnp.float32)
            running_var = 1.0 + 0.1 * jax.random.uniform(kv, (1, out_dim), jnp.float32)
            params.append({"w": w, "b": b, "gamma": gamma, "beta": beta,
                           "running_mean": running_mean,
                           "running_var": running_var})
        prev = out_dim
    return params


def ref_forward(x_a, embed_ab, dir_params, mag_params):
    def run(x, params):
        h = x
        n = len(params)
        for depth, p in enumerate(params):
            if depth == n - 1:
                h = h @ p["w"]
            else:
                h = h @ p["w"] + p["b"]
                scale = p["gamma"] / jnp.sqrt(p["running_var"] + _BN_EPS)
                shift = p["beta"] - p["running_mean"] * scale
                h = h * scale + shift
                h = jnp.maximum(h, 0.0)
        return h

    x = jnp.concatenate([x_a, embed_ab], axis=1)
    d = run(x, dir_params)
    m = run(x, mag_params)
    norm = jnp.sqrt(jnp.sum(d * d, axis=1, keepdims=True))
    d = d / jnp.maximum(norm, 1e-12)
    return d * m


# ------------------------------------- main ---------------------------------------

if __name__ == "__main__":
    B = 2
    shape_latent_dim = 32
    text_embed_dim = 32
    num_layers = 3

    key = jax.random.PRNGKey(0)
    k_xa, k_emb, k_dir, k_mag = jax.random.split(key, 4)

    x_a = jax.random.normal(k_xa, (B, shape_latent_dim), jnp.float32)
    embed_ab = jax.random.normal(k_emb, (B, text_embed_dim), jnp.float32)

    in_dim = shape_latent_dim + text_embed_dim
    dir_params = make_mlp_params(k_dir, in_dim, [shape_latent_dim] * num_layers)
    mag_params = make_mlp_params(k_mag, in_dim, [256, 128, 64, 1])

    # One-time host-side prep: fold BN into the linears, fuse layer-0 of both
    # MLPs, pack everything into one weight slab + one bias slab.
    w_slab, b_slab, cfg = pack_mapper_params(dir_params, mag_params)

    out = mlp_latent_mapper_forward(x_a, embed_ab, w_slab, b_slab, cfg=cfg)
    out = jax.block_until_ready(out)

    ref = ref_forward(x_a, embed_ab, dir_params, mag_params)
    assert out.shape == (B, shape_latent_dim)
    assert jnp.allclose(out, ref, atol=1e-5, rtol=1e-4), "mismatch vs reference"

    print("KERNEL_OK")
</pallas_src>

<mosaic_0001>
module attributes {stable_mosaic.version = 11 : i64} {
  func.func @_fused_mapper_kernel(%arg0: i32, %arg1: memref<2x32xf32, #tpu.memory_space<vmem>>, %arg2: memref<2x32xf32, #tpu.memory_space<vmem>>, %arg3: memref<576x384xf32, #tpu.memory_space<vmem>>, %arg4: memref<1x768xf32, #tpu.memory_space<vmem>>, %arg5: memref<2x32xf32, #tpu.memory_space<vmem>>) attributes {dimension_semantics = [#tpu.dimension_semantics<parallel>], iteration_bounds = array<i64: 1>, scalar_prefetch = 0 : i64, scratch_operands = 0 : i64, tpu.core_type = #tpu.core_type<tc>, window_params = [{transform_indices = @transform_0, window_bounds = array<i64: 2, 32>}, {transform_indices = @transform_1, window_bounds = array<i64: 2, 32>}, {pipeline_mode = #tpu.pipeline_mode<synchronous>, transform_indices = @transform_2, window_bounds = array<i64: 576, 384>}, {pipeline_mode = #tpu.pipeline_mode<synchronous>, transform_indices = @transform_3, window_bounds = array<i64: 1, 768>}, {transform_indices = @transform_4, window_bounds = array<i64: 2, 32>}]} {
    %c0 = arith.constant 0 : index
    %c0_0 = arith.constant 0 : index
    %0 = vector.load %arg1[%c0, %c0_0] : memref<2x32xf32, #tpu.memory_space<vmem>>, vector<2x32xf32>
    %c0_1 = arith.constant 0 : index
    %c0_2 = arith.constant 0 : index
    %1 = vector.load %arg2[%c0_1, %c0_2] : memref<2x32xf32, #tpu.memory_space<vmem>>, vector<2x32xf32>
    %c0_3 = arith.constant 0 : index
    %c0_4 = arith.constant 0 : index
    %2 = vector.load %arg3[%c0_3, %c0_4] : memref<576x384xf32, #tpu.memory_space<vmem>>, vector<32x288xf32>
    %c32 = arith.constant 32 : index
    %c0_5 = arith.constant 0 : index
    %3 = vector.load %arg3[%c32, %c0_5] : memref<576x384xf32, #tpu.memory_space<vmem>>, vector<32x288xf32>
    %c0_6 = arith.constant 0 : index
    %c0_7 = arith.constant 0 : index
    %4 = vector.load %arg4[%c0_6, %c0_7] : memref<1x768xf32, #tpu.memory_space<vmem>>, vector<1x288xf32>
    %cst = arith.constant dense<0.000000e+00> : vector<2x288xf32>
    %5 = tpu.matmul %0, %2, %cst {dimension_numbers = #tpu.dot_dimension_numbers<[1], [0], [0], [1], [0, 0, 1, 1], [], []>} : vector<2x32xf32>, vector<32x288xf32>, vector<2x288xf32> -> vector<2x288xf32>
    %cst_8 = arith.constant dense<0.000000e+00> : vector<2x288xf32>
    %6 = tpu.matmul %1, %3, %cst_8 {dimension_numbers = #tpu.dot_dimension_numbers<[1], [0], [0], [1], [0, 0, 1, 1], [], []>} : vector<2x32xf32>, vector<32x288xf32>, vector<2x288xf32> -> vector<2x288xf32>
    %7 = arith.addf %5, %6 : vector<2x288xf32>
    %8 = vector.broadcast %4 : vector<1x288xf32> to vector<2x288xf32>
    %9 = arith.addf %7, %8 : vector<2x288xf32>
    %cst_9 = arith.constant 0.000000e+00 : f32
    %10 = vector.broadcast %cst_9 : f32 to vector<2x288xf32>
    %11 = arith.maximumf %9, %10 : vector<2x288xf32>
    %12 = vector.extract_strided_slice %11 {offsets = [0, 0], sizes = [2, 256], strides = [1, 1]} : vector<2x288xf32> to vector<2x256xf32>
    %13 = vector.extract_strided_slice %11 {offsets = [0, 256], sizes = [2, 32], strides = [1, 1]} : vector<2x288xf32> to vector<2x32xf32>
    %c512 = arith.constant 512 : index
    %c0_10 = arith.constant 0 : index
    %14 = vector.load %arg3[%c512, %c0_10] : memref<576x384xf32, #tpu.memory_space<vmem>>, vector<32x32xf32>
    %cst_11 = arith.constant dense<0.000000e+00> : vector<2x32xf32>
    %15 = tpu.matmul %13, %14, %cst_11 {dimension_numbers = #tpu.dot_dimension_numbers<[1], [0], [0], [1], [0, 0, 1, 1], [], []>} : vector<2x32xf32>, vector<32x32xf32>, vector<2x32xf32> -> vector<2x32xf32>
    %c0_12 = arith.constant 0 : index
    %c640 = arith.constant 640 : index
    %16 = vector.load %arg4[%c0_12, %c640] : memref<1x768xf32, #tpu.memory_space<vmem>>, vector<1x32xf32>
    %17 = vector.broadcast %16 : vector<1x32xf32> to vector<2x32xf32>
    %18 = arith.addf %15, %17 : vector<2x32xf32>
    %cst_13 = arith.constant 0.000000e+00 : f32
    %19 = vector.broadcast %cst_13 : f32 to vector<2x32xf32>
    %20 = arith.maximumf %18, %19 : vector<2x32xf32>
    %c544 = arith.constant 544 : index
    %c0_14 = arith.constant 0 : index
    %21 = vector.load %arg3[%c544, %c0_14] : memref<576x384xf32, #tpu.memory_space<vmem>>, vector<32x32xf32>
    %cst_15 = arith.constant dense<0.000000e+00> : vector<2x32xf32>
    %22 = tpu.matmul %20, %21, %cst_15 {dimension_numbers = #tpu.dot_dimension_numbers<[1], [0], [0], [1], [0, 0, 1, 1], [], []>} : vector<2x32xf32>, vector<32x32xf32>, vector<2x32xf32> -> vector<2x32xf32>
    %c64 = arith.constant 64 : index
    %c0_16 = arith.constant 0 : index
    %23 = vector.load %arg3[%c64, %c0_16] : memref<576x384xf32, #tpu.memory_space<vmem>>, vector<256x128xf32>
    %cst_17 = arith.constant dense<0.000000e+00> : vector<2x128xf32>
    %24 = tpu.matmul %12, %23, %cst_17 {dimension_numbers = #tpu.dot_dimension_numbers<[1], [0], [0], [1], [0, 0, 1, 1], [], []>} : vector<2x256xf32>, vector<256x128xf32>, vector<2x128xf32> -> vector<2x128xf32>
    %c0_18 = arith.constant 0 : index
    %c384 = arith.constant 384 : index
    %25 = vector.load %arg4[%c0_18, %c384] : memref<1x768xf32, #tpu.memory_space<vmem>>, vector<1x128xf32>
    %26 = vector.broadcast %25 : vector<1x128xf32> to vector<2x128xf32>
    %27 = arith.addf %24, %26 : vector<2x128xf32>
    %cst_19 = arith.constant 0.000000e+00 : f32
    %28 = vector.broadcast %cst_19 : f32 to vector<2x128xf32>
    %29 = arith.maximumf %27, %28 : vector<2x128xf32>
    %c320 = arith.constant 320 : index
    %c0_20 = arith.constant 0 : index
    %30 = vector.load %arg3[%c320, %c0_20] : memref<576x384xf32, #tpu.memory_space<vmem>>, vector<128x64xf32>
    %cst_21 = arith.constant dense<0.000000e+00> : vector<2x64xf32>
    %31 = tpu.matmul %29, %30, %cst_21 {dimension_numbers = #tpu.dot_dimension_numbers<[1], [0], [0], [1], [0, 0, 1, 1], [], []>} : vector<2x128xf32>, vector<128x64xf32>, vector<2x64xf32> -> vector<2x64xf32>
    %c0_22 = arith.constant 0 : index
    %c512_23 = arith.constant 512 : index
    %32 = vector.load %arg4[%c0_22, %c512_23] : memref<1x768xf32, #tpu.memory_space<vmem>>, vector<1x64xf32>
    %33 = vector.broadcast %32 : vector<1x64xf32> to vector<2x64xf32>
    %34 = arith.addf %31, %33 : vector<2x64xf32>
    %cst_24 = arith.constant 0.000000e+00 : f32
    %35 = vector.broadcast %cst_24 : f32 to vector<2x64xf32>
    %36 = arith.maximumf %34, %35 : vector<2x64xf32>
    %c448 = arith.constant 448 : index
    %c0_25 = arith.constant 0 : index
    %37 = vector.load %arg3[%c448, %c0_25] : memref<576x384xf32, #tpu.memory_space<vmem>>, vector<64x1xf32>
    %cst_26 = arith.constant dense<0.000000e+00> : vector<2x1xf32>
    %38 = tpu.matmul %36, %37, %cst_26 {dimension_numbers = #tpu.dot_dimension_numbers<[1], [0], [0], [1], [0, 0, 1, 1], [], []>} : vector<2x64xf32>, vector<64x1xf32>, vector<2x1xf32> -> vector<2x1xf32>
    %39 = arith.mulf %22, %22 : vector<2x32xf32>
    %cst_27 = arith.constant dense<0.000000e+00> : vector<2xf32>
    %40 = vector.multi_reduction <add>, %39, %cst_27 [1] : vector<2x32xf32> to vector<2xf32>
    %41 = vector.shape_cast %40 : vector<2xf32> to vector<2x1xf32>
    %cst_28 = arith.constant 1.000000e-24 : f32
    %42 = vector.broadcast %cst_28 : f32 to vector<2x1xf32>
    %43 = arith.maximumf %41, %42 : vector<2x1xf32>
    %44 = math.rsqrt %43 : vector<2x1xf32>
    %45 = vector.broadcast %44 : vector<2x1xf32> to vector<2x32xf32>
    %46 = arith.mulf %22, %45 : vector<2x32xf32>
    %47 = vector.broadcast %38 : vector<2x1xf32> to vector<2x32xf32>
    %48 = arith.mulf %46, %47 : vector<2x32xf32>
    %c0_29 = arith.constant 0 : index
    %c0_30 = arith.constant 0 : index
    %49 = vector.load %arg5[%c0_29, %c0_30] : memref<2x32xf32, #tpu.memory_space<vmem>>, vector<2x32xf32>
    tpu.vector_store %arg5[%c0_29, %c0_30], %48 {strides = array<i32>} : memref<2x32xf32, #tpu.memory_space<vmem>>, vector<2x32xf32>,
    return
  }
  func.func @transform_0(%arg0: i32) -> (i32, i32) {
    %c0_i32 = arith.constant 0 : i32
    %c0_i32_0 = arith.constant 0 : i32
    return %arg0, %c0_i32 : i32, i32
  }
  func.func @transform_1(%arg0: i32) -> (i32, i32) {
    %c0_i32 = arith.constant 0 : i32
    %c0_i32_0 = arith.constant 0 : i32
    return %arg0, %c0_i32 : i32, i32
  }
  func.func @transform_2(%arg0: i32) -> (i32, i32) {
    %c0_i32 = arith.constant 0 : i32
    %c0_i32_0 = arith.constant 0 : i32
    %c0_i32_1 = arith.constant 0 : i32
    return %c0_i32, %c0_i32_0 : i32, i32
  }
  func.func @transform_3(%arg0: i32) -> (i32, i32) {
    %c0_i32 = arith.constant 0 : i32
    %c0_i32_0 = arith.constant 0 : i32
    %c0_i32_1 = arith.constant 0 : i32
    return %c0_i32, %c0_i32_0 : i32, i32
  }
  func.func @transform_4(%arg0: i32) -> (i32, i32) {
    %c0_i32 = arith.constant 0 : i32
    %c0_i32_0 = arith.constant 0 : i32
    return %arg0, %c0_i32 : i32, i32
  }
}

</mosaic_0001>

<bundles_post_ra>
// kernel: mlp_latent_mapper_forward.1
= control target key start
LH: loop header
LB: loop body
LE: loop exit
PB: predicated region body
PF: predicated region fallthrough
CT: control target
= control target key end

     0   :  { %9 = vsyncpa [#allocation3], 0  ;;  %s1318_s0 = inlined_call_operand.hbm [shape: f32[2,32], index: 0, kind: input, shape index: {}]   ;;  %s1319_s1 = inlined_call_operand.hbm [shape: f32[2,32], index: 1, kind: input, shape index: {}]   ;;  %s1320_s2 = inlined_call_operand.hbm [shape: f32[576,384], index: 2, kind: input, shape index: {}]   ;;  %s1321_s3 = inlined_call_operand.hbm [shape: f32[1,768], index: 3, kind: input, shape index: {}]   ;;  %s1322_s4 = inlined_call_operand.hbm [shape: f32[2,32], index: 4, kind: output, shape index: {}]  }
   0x1   :  { %10 = vsyncpa [#allocation6], 0 }
   0x2   :  { %11 = vsyncpa [#allocation9], 0 }
   0x3   :  { %12 = vsyncpa [#allocation4], 0  ;;  %s1195_s15 = smov [#allocation5]   ;;  %s1196_s17 = smov [#allocation2]  }
   0x4   :  { %s29_s16 = sshll.u32 %s1195_s15, 4  ;;  %s19_s18 = sshll.u32 %s1196_s17, 4  ;;  %s30_s16 = int_to_ptr.vmem [resolvable:$true] %s29_s16  ;;  %s20_s18 = int_to_ptr.vmem [resolvable:$true] %s19_s18 }
   0x5   :  { %s1095_s19 = scalar_lea.vmem %s30_s16, 32  ;;  %p1100_p1 = scmp.lt.s32.totalorder %s30_s16, %s30_s16 }
   0x6   :  { %p1096_p0 = scmp.ne.s32.totalorder %s30_s16, %s1095_s19  ;;  %p1101_p2 = scmp.lt.s32.totalorder %s1095_s19, %s1095_s19 }
   0x8   :  { %p1102_p3 = por %p1101_p2, %p1100_p1 }
   0xa   :  { %p1103_p4 = pnand %p1102_p3, %p1096_p0 }
   0xc   :  { %1106 = shalt.err (!%p1103_p4)
}
   0xd   :  { %32 = dma.hbm_to_vmem [thread:$0]  %s1319_s1, 32, %s30_s16, [#allocation6]  }
   0xe   :  { %s1115_s22 = scalar_lea.vmem %s20_s18, 32  ;;  %p1120_p6 = scmp.lt.s32.totalorder %s20_s18, %s20_s18 }
   0xf   :  { %p1116_p5 = scmp.ne.s32.totalorder %s20_s18, %s1115_s22  ;;  %p1121_p7 = scmp.lt.s32.totalorder %s1115_s22, %s1115_s22 }
  0x11   :  { %p1122_p8 = por %p1121_p7, %p1120_p6 }
  0x13   :  { %p1123_p9 = pnand %p1122_p8, %p1116_p5 }
  0x15   :  { %1126 = shalt.err (!%p1123_p9)
}
  0x16   :  { %22 = dma.hbm_to_vmem [thread:$0]  %s1318_s0, 32, %s20_s18, [#allocation3]  }
  0x17   :  { %s1197_s25 = smov [#allocation7]  }
  0x18   :  { %s38_s26 = sshll.u32 %s1197_s25, 4  ;;  %s39_s26 = int_to_ptr.vmem [resolvable:$true] %s38_s26 }
  0x19   :  { %s1135_s27 = scalar_lea.vmem %s39_s26, 27648  ;;  %p1140_p11 = scmp.lt.s32.totalorder %s39_s26, %s39_s26 }
  0x1a   :  { %p1136_p10 = scmp.ne.s32.totalorder %s39_s26, %s1135_s27  ;;  %p1141_p12 = scmp.lt.s32.totalorder %s1135_s27, %s1135_s27 }
  0x1c   :  { %p1142_p13 = por %p1141_p12, %p1140_p11 }
  0x1e   :  { %p1143_p0 = pnand %p1142_p13, %p1136_p10 }
  0x20   :  { %1146 = shalt.err (!%p1143_p0)
}
  0x21   :  { %s1198_s1 = smov 384   ;;  %s1199_s28 = smov 24  }
  0x22   :  { %44 = dma.hbm_to_vmem [thread:$0]  %s1320_s2, 27648, %s39_s26, [#allocation6], %s1198_s1, %s1198_s1, %s1199_s28  }
  0x23   :  { %s1200_s5 = smov [#allocation8]  }
  0x24   :  { %s51_s6 = sshll.u32 %s1200_s5, 4  ;;  %s52_s6 = int_to_ptr.vmem [resolvable:$true] %s51_s6 }
  0x25   :  { %s1155_s0 = scalar_lea.vmem %s52_s6, 96  ;;  %p1160_p2 = scmp.lt.s32.totalorder %s52_s6, %s52_s6 }
  0x26   :  { %p1156_p1 = scmp.ne.s32.totalorder %s52_s6, %s1155_s0  ;;  %p1161_p3 = scmp.lt.s32.totalorder %s1155_s0, %s1155_s0 }
  0x28   :  { %p1162_p4 = por %p1161_p3, %p1160_p2 }
  0x2a   :  { %p1163_p5 = pnand %p1162_p4, %p1156_p1 }
  0x2c   :  { %1166 = shalt.err (!%p1163_p5)
}
  0x2d   :  { %54 = dma.hbm_to_vmem [thread:$0]  %s1321_s3, 96, %s52_s6, [#allocation9]  }
  0x2e   :  { %1187 = dma.done.wait [#allocation3], 32  }
  0x2f   :  { %1188 = vsyncadd [#allocation3], 4294967264 }
  0x30   :  { %1189 = dma.done.wait [#allocation6], 27680  }
  0x31   :  { %1190 = vsyncadd [#allocation6], 4294939616 }
  0x32   :  { %1191 = dma.done.wait [#allocation9], 96  }
  0x33   :  { %1192 = vsyncadd [#allocation9], 4294967200  ;;  %v1201_v0 = vmov 0.0   ;;  %v91_v1 = vld [vmem:[#allocation7 + $0xb0] sm:$0xff]  ;;  %v90_v3 = vld [vmem:[#allocation7 + $0xa8] sm:$0xff]  ;;  %vm94_vm0 = vcmask 261120   ;;  %v384_v34 = vlaneseq }
  0x34   :  { %162 = vmatprep.mubr.f32.mxu1 %v1201_v0  ;;  %306 = vmatprep.mubr.f32.mxu0 %v1201_v0  ;;  %v79_v2 = vld [vmem:[#allocation7 + $0x50] sm:$0xff]  ;;  %v78_v4 = vld [vmem:[#allocation7 + $0x48] sm:$0xff]  ;;  %v88_v5 = vld [vmem:[#allocation7 + $0x98] sm:$0xff]  ;;  %vm1202_vm1 = vmmov 0   ;;  %vm854_vm2 = vcmask 254976   ;;  %vm779_vm3 = vcmask 523264  }
  0x35   :  { %122 = vmatprep.subr.mxu1 %v91_v1  ;;  %266 = vmatprep.subr.mxu0 %v79_v2  ;;  %v76_v6 = vld [vmem:[#allocation7 + $0x38] sm:$0xff]  ;;  %v87_v7 = vld [vmem:[#allocation7 + $0x90] sm:$0xff]  ;;  %v85_v9 = vld [vmem:[#allocation7 + $0x80] sm:$0xff]  ;;  %v1272_v35 = vshrl.u32 %v384_v34, 7  ;;  %s1204_s2 = smov [#allocation10]  }
  0x36   :  { %123 = vmatpush1.msra.mxu1 %v90_v3  ;;  %267 = vmatpush1.msra.mxu0 %v78_v4  ;;  %v75_v8 = vld [vmem:[#allocation7 + $0x30] sm:$0xff]  ;;  %v73_v10 = vld [vmem:[#allocation7 + $0x20] sm:$0xff]  ;;  %v84_v11 = vld [vmem:[#allocation7 + $0x78] sm:$0xff]  ;;  %s874_s3 = sshll.u32 %s1204_s2, 4  ;;  %s875_s3 = int_to_ptr.vmem [resolvable:$true] %s874_s3 }
  0x37   :  { %124 = vmatprep.subr.mxu1 %v88_v5  ;;  %268 = vmatprep.subr.mxu0 %v76_v6  ;;  %v72_v12 = vld [vmem:[#allocation7 + $0x18] sm:$0xff]  ;;  %v82_v13 = vld [vmem:[#allocation7 + $0x68] sm:$0xff]  ;;  %v81_v15 = vld [vmem:[#allocation7 + $0x60] sm:$0xff]  ;;  %v390_v39 = vsub.s32 1, %v1272_v35  ;;  %v394_v43 = vsub.s32 2, %v1272_v35  ;;  %s1167_s9 = scalar_lea.vmem %s875_s3, 32  ;;  %p1172_p7 = scmp.lt.s32.totalorder %s875_s3, %s875_s3 }
  0x38   :  { %125 = vmatpush1.msra.mxu1 %v87_v7  ;;  %269 = vmatpush1.msra.mxu0 %v75_v8  ;;  %v70_v14 = vld [vmem:[#allocation7 + $0x8] sm:$0xff]  ;;  %v69_v16 = vld [vmem:[#allocation7] sm:$0xff]  ;;  %v68_v17 = vld [vmem:[#allocation5] sm:$0x3]  ;;  %p1168_p6 = scmp.ne.s32.totalorder %s875_s3, %s1167_s9  ;;  %p1173_p8 = scmp.lt.s32.totalorder %s1167_s9, %s1167_s9 }
  0x39   :  { %126 = vmatprep.subr.mxu1 %v85_v9  ;;  %270 = vmatprep.subr.mxu0 %v73_v10  ;;  %v67_v18 = vld [vmem:[#allocation2] sm:$0x3]  ;;  %v89_v20 = vld [vmem:[#allocation7 + $0xa0] sm:$0xff]  ;;  %v86_v21 = vld [vmem:[#allocation7 + $0x88] sm:$0xff] }
  0x3a   :  { %127 = vmatpush1.msra.mxu1 %v84_v11  ;;  %271 = vmatpush1.msra.mxu0 %v72_v12  ;;  %v92_v19 = vld [vmem:[#allocation7 + $0xb8] sm:$0xff]  ;;  %v83_v22 = vld [vmem:[#allocation7 + $0x70] sm:$0xff]  ;;  %v77_v24 = vld [vmem:[#allocation7 + $0x40] sm:$0xff]  ;;  %v386_v11 = vsub.s32 0, %v1272_v35  ;;  %p1174_p9 = por %p1173_p8, %p1172_p7 }
  0x3b   :  { %128 = vmatprep.subr.mxu1 %v82_v13  ;;  %272 = vmatprep.subr.mxu0 %v70_v14  ;;  %v80_v23 = vld [vmem:[#allocation7 + $0x58] sm:$0xff]  ;;  %v74_v25 = vld [vmem:[#allocation7 + $0x28] sm:$0xff]  ;;  %v71_v26 = vld [vmem:[#allocation7 + $0x10] sm:$0xff] }
  0x3c   :  { %129 = vmatpush1.msra.mxu1 %v81_v15  ;;  %273 = vmatpush1.msra.mxu0 %v69_v16  ;;  %v408_v27 = vld [vmem:[#allocation7 + $0x648] sm:$0xff]  ;;  %v407_v28 = vld [vmem:[#allocation7 + $0x630] sm:$0xff]  ;;  %v406_v29 = vld [vmem:[#allocation7 + $0x618] sm:$0xff]  ;;  %p1175_p10 = pnand %p1174_p9, %p1168_p6 }
  0x3d   :  { %885 = vmatmul.mubr.msk.f32.vlgmr.msra.gmra.mxu1 %vm94_vm0, %v68_v17  ;;  %976 = vmatprep.subr.mxu1 %v1201_v0  ;;  %v405_v30 = vld [vmem:[#allocation7 + $0x600] sm:$0xff]  ;;  %v598_v31 = vld [vmem:[#allocation7 + $0x3a8] sm:$0xff]  ;;  %v597_v55 = vld [vmem:[#allocation7 + $0x390] sm:$0xff] }
  0x3e   :  { %887 = vmatmul.mubr.msk.f32.vlgmr.msra.gmra.mxu0 %vm94_vm0, %v67_v18  ;;  %977 = vmatpush3.msra.mxu1 %v92_v19  ;;  %v493_v32 = vld [vmem:[#allocation7 + $0x6a8] sm:$0xff]  ;;  %v93_v41 = vld [vmem:[#allocation8] sm:$0x7]  ;;  %v581_v56 = vld [vmem:[#allocation7 + $0x210] sm:$0xff] }
  0x3f   :  { %978 = vmatprep.subr.mxu1 %v1201_v0  ;;  %984 = vmatprep.mubr.msk.f32.mxu1 %vm1202_vm1, %v1201_v0  ;;  %v391_v45 = vrot.slane %v93_v41, %v390_v39  ;;  %v395_v46 = vrot.slane %v93_v41, %v394_v43  ;;  %v582_v53 = vld [vmem:[#allocation7 + $0x228] sm:$0xff]  ;;  %v596_v57 = vld [vmem:[#allocation7 + $0x378] sm:$0xff]  ;;  %v595_v59 = vld [vmem:[#allocation7 + $0x360] sm:$0xff] }
  0x40   :  { %979 = vmatpush3.msra.mxu1 %v89_v20  ;;  %998 = vmatprep.subr.mxu0 %v1201_v0  ;;  %v580_v58 = vld [vmem:[#allocation7 + $0x1f8] sm:$0xff]  ;;  %v579_v60 = vld [vmem:[#allocation7 + $0x1e0] sm:$0xff]  ;;  %v594_v61 = vld [vmem:[#allocation7 + $0x348] sm:$0xff] }
  0x41   :  { %980 = vmatprep.subr.mxu1 %v1201_v0  ;;  %1006 = vmatprep.mubr.msk.f32.mxu0 %vm1202_vm1, %v1201_v0  ;;  %v578_v62 = vld [vmem:[#allocation7 + $0x1c8] sm:$0xff]  ;;  %v593_v63 = vld [vmem:[#allocation7 + $0x330] sm:$0xff]  ;;  %v592_v2 = vld [vmem:[#allocation7 + $0x318] sm:$0xff] }
  0x42   :  { %981 = vmatpush3.msra.mxu1 %v86_v21  ;;  %999 = vmatpush3.msra.mxu0 %v408_v27  ;;  %v577_v1 = vld [vmem:[#allocation7 + $0x1b0] sm:$0xff]  ;;  %v576_v3 = vld [vmem:[#allocation7 + $0x198] sm:$0xff]  ;;  %v591_v4 = vld [vmem:[#allocation7 + $0x300] sm:$0xff] }
  0x43   :  { %982 = vmatprep.subr.mxu1 %v1201_v0  ;;  %1000 = vmatprep.subr.mxu0 %v1201_v0  ;;  %v575_v5 = vld [vmem:[#allocation7 + $0x180] sm:$0xff]  ;;  %v590_v6 = vld [vmem:[#allocation7 + $0x2e8] sm:$0xff]  ;;  %v589_v8 = vld [vmem:[#allocation7 + $0x2d0] sm:$0xff] }
  0x44   :  { %983 = vmatpush3.msra.mxu1 %v83_v22  ;;  %1001 = vmatpush3.msra.mxu0 %v407_v28  ;;  %v574_v7 = vld [vmem:[#allocation7 + $0x168] sm:$0xff]  ;;  %v573_v9 = vld [vmem:[#allocation7 + $0x150] sm:$0xff]  ;;  %v588_v10 = vld [vmem:[#allocation7 + $0x2b8] sm:$0xff] }
  0x45   :  { %985 = vmatmul.mubr.msk.f32.vlgmr.msra.gmra.mxu1 %vm94_vm0, %v68_v17  ;;  %987 = vmatprep.subr.mxu1 %v1201_v0  ;;  %v572_v12 = vld [vmem:[#allocation7 + $0x138] sm:$0xff]  ;;  %v587_v13 = vld [vmem:[#allocation7 + $0x2a0] sm:$0xff]  ;;  %v586_v15 = vld [vmem:[#allocation7 + $0x288] sm:$0xff]  ;;  %v387_v17 = vrot.slane %v93_v41, %v386_v11 }
  0x46   :  { %988 = vmatpush3.msra.mxu1 %v80_v23  ;;  %995 = vmatprep.mubr.msk.f32.mxu1 %vm1202_vm1, %v1201_v0  ;;  %v571_v14 = vld [vmem:[#allocation7 + $0x120] sm:$0xff]  ;;  %v585_v19 = vld [vmem:[#allocation7 + $0x270] sm:$0xff]  ;;  %v584_v21 = vld [vmem:[#allocation7 + $0x258] sm:$0xff] }
  0x47   :  { %989 = vmatprep.subr.mxu1 %v1201_v0  ;;  %1002 = vmatprep.subr.mxu0 %v1201_v0  ;;  %v569_v20 = vld [vmem:[#allocation7 + $0xf0] sm:$0xff]  ;;  %v568_v23 = vld [vmem:[#allocation7 + $0xd8] sm:$0xff]  ;;  %v692_v35 = vld [vmem:[#allocation7 + $0x528] sm:$0xff] }
  0x48   :  { %990 = vmatpush3.msra.mxu1 %v77_v24  ;;  %1003 = vmatpush3.msra.mxu0 %v406_v29  ;;  %v583_v24 = vld [vmem:[#allocation7 + $0x240] sm:$0xff]  ;;  %v492_v27 = vld [vmem:[#allocation7 + $0x690] sm:$0xff]  ;;  %v491_v28 = vld [vmem:[#allocation7 + $0x678] sm:$0xff] }
  0x49   :  { %991 = vmatprep.subr.mxu1 %v1201_v0  ;;  %1004 = vmatprep.subr.mxu0 %v1201_v0  ;;  %v490_v29 = vld [vmem:[#allocation7 + $0x660] sm:$0xff]  ;;  %v688_v39 = vld [vmem:[#allocation7 + $0x4c8] sm:$0xff]  ;;  %v686_v41 = vld [vmem:[#allocation7 + $0x498] sm:$0xff] }
  0x4a   :  { %992 = vmatpush3.msra.mxu1 %v74_v25  ;;  %1005 = vmatpush3.msra.mxu0 %v405_v30  ;;  %v567_v25 = vld [vmem:[#allocation7 + $0xc0] sm:$0xff]  ;;  %v684_v43 = vld [vmem:[#allocation7 + $0x468] sm:$0xff] }
  0x4b   :  { %993 = vmatprep.subr.mxu1 %v1201_v0  ;;  %915 = vmatprep.subr.mxu0 %v598_v31  ;;  %v889_v30 = vld [vmem:[#allocation8 + $0x5] ss:$0 sm:$0xff] }
  0x4c   :  { %994 = vmatpush3.msra.mxu1 %v71_v26 }
  0x4d   :  { %996 = vmatmul.mubr.msk.f32.vlgmr.msra.gmra.mxu1 %vm94_vm0, %v67_v18  ;;  %1009 = vmatprep.subr.mxu1 %v1201_v0  ;;  %v570_v18 = vld [vmem:[#allocation7 + $0x108] sm:$0xff] }
  0x4e   :  { %1017 = vmatprep.mubr.msk.f32.mxu1 %vm1202_vm1, %v1201_v0  ;;  %1010 = vmatpush3.msra.mxu1 %v493_v32 }
  0x4f   :  { %1011 = vmatprep.subr.mxu1 %v1201_v0 }
  0x50   :  { %1012 = vmatpush3.msra.mxu1 %v492_v27 }
  0x51   :  { %1013 = vmatprep.subr.mxu1 %v1201_v0 }
  0x52   :  { %1014 = vmatpush3.msra.mxu1 %v491_v28 }
  0x53   :  { %1015 = vmatprep.subr.mxu1 %v1201_v0 }
  0x54   :  { %1016 = vmatpush3.msra.mxu1 %v490_v29 }
  0x55   :  { %1020 = vmatprep.subr.mxu1 %v1201_v0 }
  0xfd   :  { %v1270_v33 = vpop.f32.mrf.mxu1 }
  0xfe   :  { %v1274_v37 = vpop.f32.mrf.mxu0 }
  0xff   :  { %v166_v36 = vpop.f32.mrf.mxu1  ;;  %v309_v16 = vadd.f32 %v1274_v37, %v1270_v33  ;;  %v690_v37 = vld [vmem:[#allocation7 + $0x4f8] sm:$0xff] }
 0x100   :  { %v310_v42 = vpop.f32.mrf.mxu0 }
 0x101   :  { %v311_v44 = vadd.f32 %v310_v42, %v166_v36  ;;  %v399_v22 = vadd.f32 %v387_v17, %v309_v16  ;;  %v691_v36 = vld [vmem:[#allocation7 + $0x510] sm:$0xff]  ;;  %v685_v42 = vld [vmem:[#allocation7 + $0x480] sm:$0xff] }
 0x103   :  { %v400_v49 = vadd.f32 %v391_v45, %v311_v44  ;;  %v402_v26 = vmax.f32 %v399_v22, 0.0  ;;  %v683_v44 = vld [vmem:[#allocation7 + $0x450] sm:$0xff]  ;;  %v682_v45 = vld [vmem:[#allocation7 + $0x438] sm:$0xff] }
 0x105   :  { %v235_v38 = vpop.f32.mrf.mxu1  ;;  %v403_v54 = vmax.f32 %v400_v49, 0.0  ;;  %v678_v49 = vld [vmem:[#allocation7 + $0x3d8] sm:$0xff] }
 0x107   :  { %v986_v40 = vpop.f32.mrf.mxu1 }
 0x108   :  { %v687_v40 = vld [vmem:[#allocation7 + $0x4b0] sm:$0xff] }
 0x10d   :  { %v379_v47 = vpop.f32.mrf.mxu1 }
 0x10e   :  { %v380_v48 = vadd.f32 %v379_v47, %v235_v38  ;;  %v689_v38 = vld [vmem:[#allocation7 + $0x4e0] sm:$0xff]  ;;  %v680_v47 = vld [vmem:[#allocation7 + $0x408] sm:$0xff] }
 0x10f   :  { %v997_v50 = vpop.f32.mrf.mxu1 }
 0x110   :  { %v401_v51 = vadd.f32 %v395_v46, %v380_v48  ;;  %v681_v46 = vld [vmem:[#allocation7 + $0x420] sm:$0xff]  ;;  %v679_v48 = vld [vmem:[#allocation7 + $0x3f0] sm:$0xff] }
 0x112   :  { %v404_v52 = vmax.f32 %v401_v51, 0.0  ;;  %v677_v51 = vld [vmem:[#allocation7 + $0x3c0] sm:$0xff] }
 0x114   :  { %1007 = vmatmul.mubr.msk.f32.vlgmr.msra.gmra.mxu0 %vm94_vm0, %v404_v52  ;;  %v892_v52 = vld [vmem:[#allocation8 + $0x3] ss:$0 sm:$0xff] }
 0x115   :  { %916 = vmatpush3.msra.mxu0 %v582_v53  ;;  %670 = vmatprep.mubr.f32.mxu0 %v403_v54 }
 0x116   :  { %917 = vmatprep.subr.mxu0 %v597_v55 }
 0x117   :  { %918 = vmatpush3.msra.mxu0 %v581_v56 }
 0x118   :  { %919 = vmatprep.subr.mxu0 %v596_v57  ;;  %v778_v57 = vld [vmem:[#allocation7 + $0x5e8] sm:$0xff] }
 0x119   :  { %920 = vmatpush3.msra.mxu0 %v580_v58  ;;  %v777_v58 = vld [vmem:[#allocation7 + $0x5d0] sm:$0xff] }
 0x11a   :  { %921 = vmatprep.subr.mxu0 %v595_v59  ;;  %v776_v59 = vld [vmem:[#allocation7 + $0x5b8] sm:$0xff] }
 0x11b   :  { %922 = vmatpush3.msra.mxu0 %v579_v60  ;;  %v775_v60 = vld [vmem:[#allocation7 + $0x5a0] sm:$0xff] }
 0x11c   :  { %923 = vmatprep.subr.mxu0 %v594_v61  ;;  %v774_v61 = vld [vmem:[#allocation7 + $0x588] sm:$0xff] }
 0x11d   :  { %924 = vmatpush3.msra.mxu0 %v578_v62  ;;  %v773_v62 = vld [vmem:[#allocation7 + $0x570] sm:$0xff] }
 0x11e   :  { %925 = vmatprep.subr.mxu0 %v593_v63  ;;  %v772_v63 = vld [vmem:[#allocation7 + $0x558] sm:$0xff] }
 0x11f   :  { %926 = vmatpush3.msra.mxu0 %v577_v1  ;;  %v771_v1 = vld [vmem:[#allocation7 + $0x540] sm:$0xff] }
 0x120   :  { %927 = vmatprep.subr.mxu0 %v592_v2 }
 0x121   :  { %928 = vmatpush3.msra.mxu0 %v576_v3 }
 0x122   :  { %929 = vmatprep.subr.mxu0 %v591_v4 }
 0x123   :  { %930 = vmatpush3.msra.mxu0 %v575_v5 }
 0x124   :  { %931 = vmatprep.subr.mxu0 %v590_v6  ;;  %v1203_v6 = vmov 0  }
 0x125   :  { %932 = vmatpush3.msra.mxu0 %v574_v7  ;;  %1084 = vset.pattern.permute.xlu0 %v1203_v6  ;;  %v893_v7 = vld [vmem:[#allocation8 + $0x4] ss:$0 sm:$0xff] }
 0x126   :  { %933 = vmatprep.subr.mxu0 %v589_v8 }
 0x127   :  { %934 = vmatpush3.msra.mxu0 %v573_v9 }
 0x128   :  { %935 = vmatprep.subr.mxu0 %v588_v10 }
 0x129   :  { %936 = vmatpush3.msra.mxu0 %v572_v12 }
 0x12a   :  { %937 = vmatprep.subr.mxu0 %v587_v13 }
 0x12b   :  { %938 = vmatpush3.msra.mxu0 %v571_v14 }
 0x12c   :  { %939 = vmatprep.subr.mxu0 %v586_v15 }
 0x12d   :  { %940 = vmatpush3.msra.mxu0 %v570_v18 }
 0x12e   :  { %941 = vmatprep.subr.mxu0 %v585_v19 }
 0x12f   :  { %942 = vmatpush3.msra.mxu0 %v569_v20 }
 0x130   :  { %943 = vmatprep.subr.mxu0 %v584_v21 }
 0x131   :  { %944 = vmatpush3.msra.mxu0 %v568_v23 }
 0x132   :  { %945 = vmatprep.subr.mxu0 %v583_v24 }
 0x133   :  { %946 = vmatpush3.msra.mxu0 %v567_v25 }
 0x134   :  { %671 = vmatmul.mubr.f32.vlgmr.msra.gmra.mxu0 %v402_v26  ;;  %1055 = vmatprep.subr.mxu0 %v1201_v0 }
 0x135   :  { %1071 = vmatprep.mubr.msk.f32.mxu0 %vm1202_vm1, %v1201_v0  ;;  %1056 = vmatpush3.msra.mxu0 %v778_v57 }
 0x136   :  { %1057 = vmatprep.subr.mxu0 %v1201_v0 }
 0x137   :  { %1058 = vmatpush3.msra.mxu0 %v777_v58 }
 0x138   :  { %1059 = vmatprep.subr.mxu0 %v1201_v0 }
 0x139   :  { %1060 = vmatpush3.msra.mxu0 %v776_v59 }
 0x13a   :  { %1061 = vmatprep.subr.mxu0 %v1201_v0 }
 0x13b   :  { %1062 = vmatpush3.msra.mxu0 %v775_v60 }
 0x13c   :  { %1063 = vmatprep.subr.mxu0 %v1201_v0 }
 0x13d   :  { %1064 = vmatpush3.msra.mxu0 %v774_v61 }
 0x13e   :  { %1065 = vmatprep.subr.mxu0 %v1201_v0 }
 0x13f   :  { %1066 = vmatpush3.msra.mxu0 %v773_v62 }
 0x140   :  { %1067 = vmatprep.subr.mxu0 %v1201_v0 }
 0x141   :  { %1068 = vmatpush3.msra.mxu0 %v772_v63 }
 0x142   :  { %1069 = vmatprep.subr.mxu0 %v1201_v0 }
 0x143   :  { %1070 = vmatpush3.msra.mxu0 %v771_v1 }
 0x1d4   :  { %v485_v31 = vpop.f32.mrf.mxu0 }
 0x1d5   :  { %v486_v32 = vadd.f32 %v889_v30, %v485_v31 }
 0x1d6   :  { %v1008_v33 = vpop.f32.mrf.mxu0 }
 0x1d7   :  { %v489_v34 = vmax.f32 %v486_v32, 0.0 }
 0x1d9   :  { %1018 = vmatmul.mubr.msk.f32.vlgmr.msra.gmra.mxu1 %vm94_vm0, %v489_v34 }
 0x1da   :  { %1021 = vmatpush3.msra.mxu1 %v692_v35  ;;  %1052 = vmatprep.mubr.msk.f32.mxu1 %vm1202_vm1, %v1201_v0 }
 0x1db   :  { %1022 = vmatprep.subr.mxu1 %v1201_v0 }
 0x1dc   :  { %1023 = vmatpush3.msra.mxu1 %v691_v36 }
 0x1dd   :  { %1024 = vmatprep.subr.mxu1 %v1201_v0 }
 0x1de   :  { %1025 = vmatpush3.msra.mxu1 %v690_v37 }
 0x1df   :  { %1026 = vmatprep.subr.mxu1 %v1201_v0 }
 0x1e0   :  { %1027 = vmatpush3.msra.mxu1 %v689_v38 }
 0x1e1   :  { %1028 = vmatprep.subr.mxu1 %v1201_v0 }
 0x1e2   :  { %1029 = vmatpush3.msra.mxu1 %v688_v39 }
 0x1e3   :  { %1030 = vmatprep.subr.mxu1 %v1201_v0 }
 0x1e4   :  { %1031 = vmatpush3.msra.mxu1 %v687_v40 }
 0x1e5   :  { %1032 = vmatprep.subr.mxu1 %v1201_v0 }
 0x1e6   :  { %1033 = vmatpush3.msra.mxu1 %v686_v41 }
 0x1e7   :  { %1034 = vmatprep.subr.mxu1 %v1201_v0 }
 0x1e8   :  { %1035 = vmatpush3.msra.mxu1 %v685_v42 }
 0x1e9   :  { %1036 = vmatprep.subr.mxu1 %v1201_v0 }
 0x1ea   :  { %1037 = vmatpush3.msra.mxu1 %v684_v43 }
 0x1eb   :  { %1038 = vmatprep.subr.mxu1 %v1201_v0 }
 0x1ec   :  { %1039 = vmatpush3.msra.mxu1 %v683_v44 }
 0x1ed   :  { %1040 = vmatprep.subr.mxu1 %v1201_v0 }
 0x1ee   :  { %1041 = vmatpush3.msra.mxu1 %v682_v45 }
 0x1ef   :  { %1042 = vmatprep.subr.mxu1 %v1201_v0 }
 0x1f0   :  { %1043 = vmatpush3.msra.mxu1 %v681_v46 }
 0x1f1   :  { %1044 = vmatprep.subr.mxu1 %v1201_v0 }
 0x1f2   :  { %1045 = vmatpush3.msra.mxu1 %v680_v47 }
 0x1f3   :  { %1046 = vmatprep.subr.mxu1 %v1201_v0 }
 0x1f4   :  { %v947_v50 = vpop.f32.mrf.mxu0  ;;  %1047 = vmatpush3.msra.mxu1 %v679_v48 }
 0x1f5   :  { %1048 = vmatprep.subr.mxu1 %v1201_v0 }
 0x1f6   :  { %v948_v53 = vpop.f32.mrf.mxu0  ;;  %1049 = vmatpush3.msra.mxu1 %v678_v49 }
 0x1f7   :  { %v949_v54 = vadd.f32 %v948_v53, %v947_v50  ;;  %1050 = vmatprep.subr.mxu1 %v1201_v0 }
 0x1f8   :  { %1051 = vmatpush3.msra.mxu1 %v677_v51 }
 0x1f9   :  { %v673_v55 = vadd.f32 %v949_v54, %v892_v52 }
 0x1fb   :  { %v676_v56 = vmax.f32 %v673_v55, 0.0 }
 0x1fd   :  { %1053 = vmatmul.mubr.f32.vlgmr.msra.gmra.mxu1 %v676_v56 }
 0x299   :  { %v563_v2 = vpop.f32.mrf.mxu1 }
 0x29a   :  { %v853_v3 = vmul.f32 %v563_v2, %v563_v2 }
 0x29b   :  { %v1019_v4 = vpop.f32.mrf.mxu1 }
 0x29c   :  { %v855_v5 = vsel %vm854_vm2, %v853_v3, 0.0 }
 0x29d   :  { %856 = vadd.xlane.f32.xlu0 %v855_v5 }
 0x2bd   :  { %v766_v8 = vpop.f32.mrf.mxu1 }
 0x2be   :  { %v767_v9 = vadd.f32 %v893_v7, %v766_v8 }
 0x2bf   :  { %v1054_v10 = vpop.f32.mrf.mxu1 }
 0x2c0   :  { %v770_v11 = vmax.f32 %v767_v9, 0.0 }
 0x2c2   :  { %1072 = vmatmul.mubr.msk.f32.vlgmr.msra.gmra.mxu0 %vm779_vm3, %v770_v11 }
 0x326   :  { %v857_v13 = vpop.xlane.xlu0 %856 }
 0x327   :  { %v858_v14 = vmax.f32 %v857_v13, 1e-24 }
 0x329   :  { %1085 = vrsqrt.f32 %v858_v14 }
 0x336   :  { %v1086_v15 = vpop.eup %1085 }
 0x337   :  { %v860_v16 = vmul.f32 %v1086_v15, %v563_v2 }
 0x382   :  { %v849_v12 = vpop.f32.mrf.mxu0 }
 0x383   :  { %863 = vperm.xlu0 %1084, %v849_v12  }
 0x384   :  { %v1073_v0 = vpop.f32.mrf.mxu0 }
 0x3fe   :  { %v864_v17 = vpop.permute.xlu0 %863 }
 0x3ff   :  { %v866_v18 = vmul.f32 %v864_v17, %v860_v16 }
 0x401   :  { %867 = vst.msk [vmem:[#allocation10] sm:$0x3] %vm854_vm2, %v866_v18 }
 0x402   :  { %1178 = shalt.err (!%p1175_p10)
}
 0x403   :  { %877 = dma.vmem_to_hbm [thread:$0]  %s875_s3, 32, %s1322_s4, [#allocation4]  }
 0x404   :  { %1193 = dma.done.wait [#allocation4], 32  }
 0x405   :  { %1194 = vsyncadd [#allocation4], 4294967264 }
 0x406   :  { %881 = vsyncpa [#allocation3], 1 }
 0x407   :  { %882 = vsyncpa [#allocation6], 1 }
 0x408   :  { %883 = vsyncpa [#allocation9], 1 }
 0x409   :  { %884 = vsyncpa [#allocation4], 1 }

</bundles_post_ra>
